<compile_context>
chip_gen: v5e
topology: v5e:2x2
jax: 0.10.0
libtpu: 0.0.40
codegen_flags: <defaults>
</compile_context>

<pallas_src>
import functools
import math

import jax
import jax.numpy as jnp
from jax import lax
from jax.experimental import pallas as pl
from jax.experimental.pallas import tpu as pltpu

_INV_SQRT2 = 1.0 / math.sqrt(2.0)


def _round_up(x, m):
    return ((x + m - 1) // m) * m


def _device_kind():
    try:
        return jax.devices()[0].device_kind.lower()
    except Exception:
        return ""


def _vmem_capacity_bytes(kind):
    try:
        return int(pltpu.get_tpu_info().vmem_capacity_bytes)
    except Exception:
        # v7x: 64 MiB per TensorCore; v5e/v6e (and fallback): 128 MiB.
        return (64 << 20) if ("v7" in kind or "7x" in kind) else (128 << 20)


def _has_bf16_vpu(kind):
    # v6e / v7x have bf16-native VPU/EUP; v5e (and unknown) -> f32 elementwise.
    return any(tag in kind for tag in ("v6", "v7", "7x"))


def _pick_row_tile(M, row_tile):
    """Row tile that is (8,128)-legal and gives >=2 grid steps when possible."""
    if M <= 8:
        return M                      # single full-array block (always legal)
    if M < 16:
        return 8                      # 2 blocks; partial last block is masked
    # At most half of M (so the "parallel" row axis has >=2 steps for the two
    # v7x TensorCores), capped by the per-generation row_tile.
    tm = min(row_tile, _round_up(pl.cdiv(M, 2), 8))
    if tm >= 256:
        tm = (tm // 256) * 256        # align the M tile with the 256-wide MXU
    return max(8, (tm // 8) * 8)


def _mlp_classifier_kernel(x_ref, w1_ref, b1_ref, w2_ref, b2_ref, o_ref, *,
                           act_dtype, approximate_gelu):
    # One (TM, H) row tile per grid step; weights/biases are VMEM-resident.
    # x arrives in its original dtype; cast at the MXU boundary only.
    x = x_ref[...].astype(w1_ref.dtype)                     # (TM, H)

    # h = x @ W1 + b1 ; W1 is pre-transposed to (in, out) in the wrapper,
    # so this is a plain contraction. f32 accumulation on the MXU.
    h = jnp.dot(x, w1_ref[...], preferred_element_type=jnp.float32)
    h = h + b1_ref[...]                                     # (TM, H) f32 bias add

    # GELU in act_dtype: bf16 on bf16-VPU generations (v6e/v7x), f32 on v5e.
    h = h.astype(act_dtype)
    if approximate_gelu:
        # Opt-in tanh approximation (single EUP push); deviates from the
        # PyTorch exact-GELU default, so it is off by default.
        a = jax.nn.gelu(h, approximate=True)
    else:
        # Exact GELU (PyTorch nn.GELU default): 0.5*h*(1+erf(h/sqrt(2))).
        a = 0.5 * h * (1.0 + lax.erf(h * _INV_SQRT2))

    # Dropout: identity at inference time (PyTorch Dropout in eval mode).
    # TODO(synk): training-mode dropout via pltpu.prng_seed / prng_random_bits.

    # Second layer over the lane-padded label dim (LP = round_up(L, 128)).
    a = a.astype(w2_ref.dtype)                              # cast only at MXU boundary
    out = jnp.dot(a, w2_ref[...], preferred_element_type=jnp.float32)
    out = out + b2_ref[...]                                 # (TM, LP) f32
    o_ref[...] = out.astype(o_ref.dtype)


def multi_nonlinear_classifier(x, w1, b1, w2, b2, *,
                               compute_dtype=jnp.bfloat16,
                               out_dtype=None,
                               row_tile=None,
                               approximate_gelu=False):
    """x: (B, S, H); w1: (H, H) torch (out,in); b1: (H,); w2: (L, H); b2: (L,).

    Returns (B, S, L) logits in `out_dtype` (defaults to `compute_dtype`, i.e.
    bf16 on the production path, to keep the lane-padded writeback cheap).
    """
    B, S, H = x.shape
    L = w2.shape[0]
    M = B * S

    kind = _device_kind()
    vmem_cap = _vmem_capacity_bytes(kind)
    if out_dtype is None:
        out_dtype = compute_dtype
    # Elementwise (GELU) dtype: bf16 only on bf16-VPU chips and bf16 compute.
    act_dtype = (jnp.bfloat16
                 if (jnp.dtype(compute_dtype) == jnp.dtype(jnp.bfloat16)
                     and _has_bf16_vpu(kind))
                 else jnp.float32)

    LP = _round_up(L, 128)                                  # lane-dense output
    if row_tile is None:
        row_tile = 1024 if vmem_cap >= (100 << 20) else 512
    TM = _pick_row_tile(M, row_tile)
    grid = (pl.cdiv(M, TM),)                                # partial last tile OK

    # x: free reshape only — no pad / dtype-cast pass over HBM.
    x2d = x.reshape(M, H)

    # One-time weight prep: PyTorch (out,in) -> (in,out) so both matmuls are
    # plain A @ B; label dim zero-padded to LP (padded cols are inert).
    w1_t = jnp.asarray(w1, compute_dtype).T                 # (H, H)
    w2_t = jnp.zeros((H, LP), compute_dtype).at[:, :L].set(
        jnp.asarray(w2, compute_dtype).T)                   # (H, LP)
    b1_2d = jnp.asarray(b1, jnp.float32).reshape(1, H)
    b2_2d = jnp.zeros((1, LP), jnp.float32).at[:, :L].set(
        jnp.asarray(b2, jnp.float32).reshape(1, L))

    x_isz = jnp.dtype(x.dtype).itemsize
    c_isz = jnp.dtype(compute_dtype).itemsize
    o_isz = jnp.dtype(out_dtype).itemsize

    cost = pl.CostEstimate(
        flops=2 * M * H * (H + LP),
        transcendentals=M * H,
        bytes_accessed=(M * H * x_isz            # x (read once, original dtype)
                        + H * H * c_isz          # W1
                        + LP * H * c_isz         # W2
                        + (H + LP) * 4           # biases
                        + M * LP * o_isz))       # out

    def run(adt, single_buffer_weights):
        kernel = functools.partial(_mlp_classifier_kernel,
                                   act_dtype=adt,
                                   approximate_gelu=approximate_gelu)
        resident = ({"pipeline_mode": pl.Buffered(1)}
                    if single_buffer_weights else {})
        wbuf = 1 if single_buffer_weights else 2
        vmem_needed = (2 * TM * H * x_isz                   # x tiles (double-buffered)
                       + 2 * TM * LP * o_isz                # out tiles
                       + wbuf * (H * H + H * LP) * c_isz    # resident weights
                       + wbuf * (H + LP) * 4                # resident biases (f32)
                       + TM * H * (4 + jnp.dtype(adt).itemsize)  # f32 h + activation
                       + TM * LP * 4)                       # f32 accumulator pre-cast
        # Per-generation cap: ~3/4 of physical VMEM (≈96 MiB v5e/v6e, ≈48 MiB v7x).
        vmem_limit = int(min(max(2 * vmem_needed, 8 << 20), (3 * vmem_cap) // 4))
        # TODO(synk): tile the K (hidden) dimension when H is so large that the
        # resident weights alone exceed the per-generation VMEM budget.
        return pl.pallas_call(
            kernel,
            out_shape=jax.ShapeDtypeStruct((M, LP), out_dtype),
            grid=grid,
            in_specs=[
                pl.BlockSpec((TM, H), lambda i: (i, 0)),               # x: row-streamed
                pl.BlockSpec((H, H), lambda i: (0, 0), **resident),    # W1: resident
                pl.BlockSpec((1, H), lambda i: (0, 0), **resident),    # b1: resident
                pl.BlockSpec((H, LP), lambda i: (0, 0), **resident),   # W2: resident
                pl.BlockSpec((1, LP), lambda i: (0, 0), **resident),   # b2: resident
            ],
            out_specs=pl.BlockSpec((TM, LP), lambda i: (i, 0)),
            compiler_params=pltpu.CompilerParams(
                dimension_semantics=("parallel",),          # rows independent; 2 TCs on v7x
                vmem_limit_bytes=vmem_limit),
            cost_estimate=cost,
        )(x2d, w1_t, b1_2d, w2_t, b2_2d)

    # Preferred config first; fall back if the running jax/Mosaic rejects
    # single-buffered resident blocks (pl.Buffered(1)) or bf16 erf.
    configs = [(act_dtype, True), (act_dtype, False)]
    if jnp.dtype(act_dtype) != jnp.dtype(jnp.float32):
        configs += [(jnp.float32, True), (jnp.float32, False)]
    out2d, last_err = None, None
    for adt, single_buf in configs:
        try:
            out2d = run(adt, single_buf)
            break
        except Exception as e:   # pragma: no cover — feature fallback only
            last_err = e
    if out2d is None:
        raise last_err

    # Slice off the lane padding; callers that tolerate (M, LP) can skip this.
    return out2d[:, :L].reshape(B, S, L)


def _reference(x, w1, b1, w2, b2):
    h = jnp.einsum("bsh,oh->bso", x, w1) + b1
    a = 0.5 * h * (1.0 + lax.erf(h / jnp.sqrt(2.0)))
    return jnp.einsum("bsh,oh->bso", a, w2) + b2


if __name__ == "__main__":
    # Small shapes consistent with the module: batch=2, seq=8, hidden=32, labels=5
    B, S, H, L = 2, 8, 32, 5

    key = jax.random.PRNGKey(0)
    k_x, k_w1, k_b1, k_w2, k_b2 = jax.random.split(key, 5)

    x = jax.random.normal(k_x, (B, S, H), dtype=jnp.float32)
    # PyTorch Linear layouts: weight (out, in), bias (out,)
    w1 = jax.random.normal(k_w1, (H, H), dtype=jnp.float32) * 0.05
    b1 = jax.random.normal(k_b1, (H,), dtype=jnp.float32) * 0.01
    w2 = jax.random.normal(k_w2, (L, H), dtype=jnp.float32) * 0.05
    b2 = jax.random.normal(k_b2, (L,), dtype=jnp.float32) * 0.01

    ref = _reference(x, w1, b1, w2, b2)

    # Exact-parity path (f32 MXU operands, f32 elementwise, f32 output).
    out_f32 = jax.block_until_ready(
        multi_nonlinear_classifier(x, w1, b1, w2, b2, compute_dtype=jnp.float32))
    assert out_f32.shape == (B, S, L), out_f32.shape
    assert out_f32.dtype == jnp.float32, out_f32.dtype
    assert jnp.allclose(out_f32, ref, atol=1e-4, rtol=1e-4), float(
        jnp.max(jnp.abs(out_f32 - ref)))

    # Default production path (bf16 operands, f32 accumulation, bf16 output,
    # bf16 GELU on bf16-VPU generations).
    out_bf16 = multi_nonlinear_classifier(x, w1, b1, w2, b2)
    out_bf16 = jax.block_until_ready(out_bf16).astype(jnp.float32)
    assert out_bf16.shape == (B, S, L), out_bf16.shape
    assert jnp.allclose(out_bf16, ref, atol=3e-2, rtol=3e-2), float(
        jnp.max(jnp.abs(out_bf16 - ref)))

    print("KERNEL_OK")
</pallas_src>

<mosaic_0001>
module attributes {stable_mosaic.version = 11 : i64} {
  func.func @_mlp_classifier_kernel(%arg0: i32, %arg1: memref<8x32xf32, #tpu.memory_space<vmem>>, %arg2: memref<32x32xf32, #tpu.memory_space<vmem>>, %arg3: memref<1x32xf32, #tpu.memory_space<vmem>>, %arg4: memref<32x128xf32, #tpu.memory_space<vmem>>, %arg5: memref<1x128xf32, #tpu.memory_space<vmem>>, %arg6: memref<8x128xf32, #tpu.memory_space<vmem>>) attributes {dimension_semantics = [#tpu.dimension_semantics<parallel>], iteration_bounds = array<i64: 2>, scalar_prefetch = 0 : i64, scratch_operands = 0 : i64, tpu.core_type = #tpu.core_type<tc>, window_params = [{transform_indices = @transform_0, window_bounds = array<i64: 8, 32>}, {pipeline_mode = #tpu.pipeline_mode<synchronous>, transform_indices = @transform_1, window_bounds = array<i64: 32, 32>}, {pipeline_mode = #tpu.pipeline_mode<synchronous>, transform_indices = @transform_2, window_bounds = array<i64: 1, 32>}, {pipeline_mode = #tpu.pipeline_mode<synchronous>, transform_indices = @transform_3, window_bounds = array<i64: 32, 128>}, {pipeline_mode = #tpu.pipeline_mode<synchronous>, transform_indices = @transform_4, window_bounds = array<i64: 1, 128>}, {transform_indices = @transform_5, window_bounds = array<i64: 8, 128>}]} {
    %c0 = arith.constant 0 : index
    %c0_0 = arith.constant 0 : index
    %0 = vector.load %arg1[%c0, %c0_0] : memref<8x32xf32, #tpu.memory_space<vmem>>, vector<8x32xf32>
    %c0_1 = arith.constant 0 : index
    %c0_2 = arith.constant 0 : index
    %1 = vector.load %arg2[%c0_1, %c0_2] : memref<32x32xf32, #tpu.memory_space<vmem>>, vector<32x32xf32>
    %cst = arith.constant dense<0.000000e+00> : vector<8x32xf32>
    %2 = tpu.matmul %0, %1, %cst {dimension_numbers = #tpu.dot_dimension_numbers<[1], [0], [0], [1], [0, 0, 1, 1], [], []>} : vector<8x32xf32>, vector<32x32xf32>, vector<8x32xf32> -> vector<8x32xf32>
    %c0_3 = arith.constant 0 : index
    %c0_4 = arith.constant 0 : index
    %3 = vector.load %arg3[%c0_3, %c0_4] : memref<1x32xf32, #tpu.memory_space<vmem>>, vector<1x32xf32>
    %4 = vector.broadcast %3 : vector<1x32xf32> to vector<8x32xf32>
    %5 = arith.addf %2, %4 : vector<8x32xf32>
    %cst_5 = arith.constant 5.000000e-01 : f32
    %6 = vector.broadcast %cst_5 : f32 to vector<8x32xf32>
    %7 = arith.mulf %6, %5 : vector<8x32xf32>
    %cst_6 = arith.constant 0.707106769 : f32
    %8 = vector.broadcast %cst_6 : f32 to vector<8x32xf32>
    %9 = arith.mulf %5, %8 : vector<8x32xf32>
    %10 = math.erf %9 : vector<8x32xf32>
    %cst_7 = arith.constant 1.000000e+00 : f32
    %11 = vector.broadcast %cst_7 : f32 to vector<8x32xf32>
    %12 = arith.addf %11, %10 : vector<8x32xf32>
    %13 = arith.mulf %7, %12 : vector<8x32xf32>
    %c0_8 = arith.constant 0 : index
    %c0_9 = arith.constant 0 : index
    %14 = vector.load %arg4[%c0_8, %c0_9] : memref<32x128xf32, #tpu.memory_space<vmem>>, vector<32x128xf32>
    %cst_10 = arith.constant dense<0.000000e+00> : vector<8x128xf32>
    %15 = tpu.matmul %13, %14, %cst_10 {dimension_numbers = #tpu.dot_dimension_numbers<[1], [0], [0], [1], [0, 0, 1, 1], [], []>} : vector<8x32xf32>, vector<32x128xf32>, vector<8x128xf32> -> vector<8x128xf32>
    %c0_11 = arith.constant 0 : index
    %c0_12 = arith.constant 0 : index
    %16 = vector.load %arg5[%c0_11, %c0_12] : memref<1x128xf32, #tpu.memory_space<vmem>>, vector<1x128xf32>
    %17 = vector.broadcast %16 : vector<1x128xf32> to vector<8x128xf32>
    %18 = arith.addf %15, %17 : vector<8x128xf32>
    %c0_13 = arith.constant 0 : index
    %c0_14 = arith.constant 0 : index
    %19 = vector.load %arg6[%c0_13, %c0_14] : memref<8x128xf32, #tpu.memory_space<vmem>>, vector<8x128xf32>
    tpu.vector_store %arg6[%c0_13, %c0_14], %18 {strides = array<i32>} : memref<8x128xf32, #tpu.memory_space<vmem>>, vector<8x128xf32>,
    return
  }
  func.func @transform_0(%arg0: i32) -> (i32, i32) {
    %c0_i32 = arith.constant 0 : i32
    %c0_i32_0 = arith.constant 0 : i32
    return %arg0, %c0_i32 : i32, i32
  }
  func.func @transform_1(%arg0: i32) -> (i32, i32) {
    %c0_i32 = arith.constant 0 : i32
    %c0_i32_0 = arith.constant 0 : i32
    %c0_i32_1 = arith.constant 0 : i32
    return %c0_i32, %c0_i32_0 : i32, i32
  }
  func.func @transform_2(%arg0: i32) -> (i32, i32) {
    %c0_i32 = arith.constant 0 : i32
    %c0_i32_0 = arith.constant 0 : i32
    %c0_i32_1 = arith.constant 0 : i32
    return %c0_i32, %c0_i32_0 : i32, i32
  }
  func.func @transform_3(%arg0: i32) -> (i32, i32) {
    %c0_i32 = arith.constant 0 : i32
    %c0_i32_0 = arith.constant 0 : i32
    %c0_i32_1 = arith.constant 0 : i32
    return %c0_i32, %c0_i32_0 : i32, i32
  }
  func.func @transform_4(%arg0: i32) -> (i32, i32) {
    %c0_i32 = arith.constant 0 : i32
    %c0_i32_0 = arith.constant 0 : i32
    %c0_i32_1 = arith.constant 0 : i32
    return %c0_i32, %c0_i32_0 : i32, i32
  }
  func.func @transform_5(%arg0: i32) -> (i32, i32) {
    %c0_i32 = arith.constant 0 : i32
    %c0_i32_0 = arith.constant 0 : i32
    return %arg0, %c0_i32 : i32, i32
  }
}

module attributes {stable_mosaic.version = 11 : i64} {
  func.func @_mlp_classifier_kernel(%arg0: i32, %arg1: memref<8x32xf32, #tpu.memory_space<vmem>>, %arg2: memref<32x32xf32, #tpu.memory_space<vmem>>, %arg3: memref<1x32xf32, #tpu.memory_space<vmem>>, %arg4: memref<32x128xf32, #tpu.memory_space<vmem>>, %arg5: memref<1x128xf32, #tpu.memory_space<vmem>>, %arg6: memref<8x128xf32, #tpu.memory_space<vmem>>) attributes {dimension_semantics = [#tpu.dimension_semantics<parallel>], iteration_bounds = array<i64: 2>, scalar_prefetch = 0 : i64, scratch_operands = 0 : i64, tpu.core_type = #tpu.core_type<tc>, window_params = [{transform_indices = @transform_0, window_bounds = array<i64: 8, 32>}, {pipeline_mode = #tpu.pipeline_mode<synchronous>, transform_indices = @transform_1, window_bounds = array<i64: 32, 32>}, {pipeline_mode = #tpu.pipeline_mode<synchronous>, transform_indices = @transform_2, window_bounds = array<i64: 1, 32>}, {pipeline_mode = #tpu.pipeline_mode<synchronous>, transform_indices = @transform_3, window_bounds = array<i64: 32, 128>}, {pipeline_mode = #tpu.pipeline_mode<synchronous>, transform_indices = @transform_4, window_bounds = array<i64: 1, 128>}, {transform_indices = @transform_5, window_bounds = array<i64: 8, 128>}]} {
    %c0 = arith.constant 0 : index
    %c0_0 = arith.constant 0 : index
    %0 = vector.load %arg1[%c0, %c0_0] : memref<8x32xf32, #tpu.memory_space<vmem>>, vector<8x32xf32>
    %c0_1 = arith.constant 0 : index
    %c0_2 = arith.constant 0 : index
    %1 = vector.load %arg2[%c0_1, %c0_2] : memref<32x32xf32, #tpu.memory_space<vmem>>, vector<32x32xf32>
    %cst = arith.constant dense<0.000000e+00> : vector<8x32xf32>
    %2 = tpu.matmul %0, %1, %cst {dimension_numbers = #tpu.dot_dimension_numbers<[1], [0], [0], [1], [0, 0, 1, 1], [], []>} : vector<8x32xf32>, vector<32x32xf32>, vector<8x32xf32> -> vector<8x32xf32>
    %c0_3 = arith.constant 0 : index
    %c0_4 = arith.constant 0 : index
    %3 = vector.load %arg3[%c0_3, %c0_4] : memref<1x32xf32, #tpu.memory_space<vmem>>, vector<1x32xf32>
    %4 = vector.broadcast %3 : vector<1x32xf32> to vector<8x32xf32>
    %5 = arith.addf %2, %4 : vector<8x32xf32>
    %cst_5 = arith.constant 5.000000e-01 : f32
    %6 = vector.broadcast %cst_5 : f32 to vector<8x32xf32>
    %7 = arith.mulf %6, %5 : vector<8x32xf32>
    %cst_6 = arith.constant 0.707106769 : f32
    %8 = vector.broadcast %cst_6 : f32 to vector<8x32xf32>
    %9 = arith.mulf %5, %8 : vector<8x32xf32>
    %10 = math.erf %9 : vector<8x32xf32>
    %cst_7 = arith.constant 1.000000e+00 : f32
    %11 = vector.broadcast %cst_7 : f32 to vector<8x32xf32>
    %12 = arith.addf %11, %10 : vector<8x32xf32>
    %13 = arith.mulf %7, %12 : vector<8x32xf32>
    %c0_8 = arith.constant 0 : index
    %c0_9 = arith.constant 0 : index
    %14 = vector.load %arg4[%c0_8, %c0_9] : memref<32x128xf32, #tpu.memory_space<vmem>>, vector<32x128xf32>
    %cst_10 = arith.constant dense<0.000000e+00> : vector<8x128xf32>
    %15 = tpu.matmul %13, %14, %cst_10 {dimension_numbers = #tpu.dot_dimension_numbers<[1], [0], [0], [1], [0, 0, 1, 1], [], []>} : vector<8x32xf32>, vector<32x128xf32>, vector<8x128xf32> -> vector<8x128xf32>
    %c0_11 = arith.constant 0 : index
    %c0_12 = arith.constant 0 : index
    %16 = vector.load %arg5[%c0_11, %c0_12] : memref<1x128xf32, #tpu.memory_space<vmem>>, vector<1x128xf32>
    %17 = vector.broadcast %16 : vector<1x128xf32> to vector<8x128xf32>
    %18 = arith.addf %15, %17 : vector<8x128xf32>
    %c0_13 = arith.constant 0 : index
    %c0_14 = arith.constant 0 : index
    %19 = vector.load %arg6[%c0_13, %c0_14] : memref<8x128xf32, #tpu.memory_space<vmem>>, vector<8x128xf32>
    tpu.vector_store %arg6[%c0_13, %c0_14], %18 {strides = array<i32>} : memref<8x128xf32, #tpu.memory_space<vmem>>, vector<8x128xf32>,
    return
  }
  func.func @transform_0(%arg0: i32) -> (i32, i32) {
    %c0_i32 = arith.constant 0 : i32
    %c0_i32_0 = arith.constant 0 : i32
    return %arg0, %c0_i32 : i32, i32
  }
  func.func @transform_1(%arg0: i32) -> (i32, i32) {
    %c0_i32 = arith.constant 0 : i32
    %c0_i32_0 = arith.constant 0 : i32
    %c0_i32_1 = arith.constant 0 : i32
    return %c0_i32, %c0_i32_0 : i32, i32
  }
  func.func @transform_2(%arg0: i32) -> (i32, i32) {
    %c0_i32 = arith.constant 0 : i32
    %c0_i32_0 = arith.constant 0 : i32
    %c0_i32_1 = arith.constant 0 : i32
    return %c0_i32, %c0_i32_0 : i32, i32
  }
  func.func @transform_3(%arg0: i32) -> (i32, i32) {
    %c0_i32 = arith.constant 0 : i32
    %c0_i32_0 = arith.constant 0 : i32
    %c0_i32_1 = arith.constant 0 : i32
    return %c0_i32, %c0_i32_0 : i32, i32
  }
  func.func @transform_4(%arg0: i32) -> (i32, i32) {
    %c0_i32 = arith.constant 0 : i32
    %c0_i32_0 = arith.constant 0 : i32
    %c0_i32_1 = arith.constant 0 : i32
    return %c0_i32, %c0_i32_0 : i32, i32
  }
  func.func @transform_5(%arg0: i32) -> (i32, i32) {
    %c0_i32 = arith.constant 0 : i32
    %c0_i32_0 = arith.constant 0 : i32
    return %arg0, %c0_i32 : i32, i32
  }
}

</mosaic_0001>

<bundles_post_ra>
// kernel: tpu_custom_call.1
= control target key start
LH: loop header
LB: loop body
LE: loop exit
PB: predicated region body
PF: predicated region fallthrough
CT: control target
= control target key end

     0   :  { %10 = vsyncpa [#allocation3], 0  ;;  %s934_s0 = inlined_call_operand.hbm [shape: f32[16,32], index: 0, kind: input, shape index: {}]   ;;  %s935_s1 = inlined_call_operand.hbm [shape: f32[32,32], index: 1, kind: input, shape index: {}]   ;;  %s936_s2 = inlined_call_operand.vmem [shape: f32[1,32], index: 2, kind: input, shape index: {}]   ;;  %s937_s3 = inlined_call_operand.hbm [shape: f32[32,128], index: 3, kind: input, shape index: {}]   ;;  %s938_s4 = inlined_call_operand.vmem [shape: f32[1,128], index: 4, kind: input, shape index: {}]   ;;  %s939_s5 = inlined_call_operand.hbm [shape: f32[16,128], index: 5, kind: output, shape index: {}]  }
   0x1   :  { %12 = vsyncpa [#allocation3 + $0x1], 0 }
   0x2   :  { %13 = vsyncpa [#allocation6], 0 }
   0x3   :  { %14 = vsyncpa [#allocation4], 0 }
   0x4   :  { %16 = vsyncpa [#allocation4 + $0x1], 0  ;;  %s777_s18 = smov 0   ;;  %s779_s19 = smov 0  }
   0x5   :  { %s781_s20 = smov 0   ;;  %s783_s21 = smov 0  }
   0x6 LB: > { %s174_s24 = sshll.u32 %s935_s1, 4  ;;  %s801_s25 = sadd.s32 4294967295, %s741_s21   ;;  %s741_s21 = sphi %s783_s21, %s950_s21   ;;  %s737_s20 = sphi %s781_s20, %s949_s20   ;;  %s733_s19 = sphi %s779_s19, %s948_s19   ;;  %s729_s18 = sphi %s777_s18, %s947_s18   ;;  %s175_s24 = int_to_ptr.hbm [resolvable:$true] %s174_s24 }
   0x7   : > { %p490_p0 = scmp.ge.s32.totalorder %s741_s21, 1  ;;  %p43_p1 = scmp.eq.s32.totalorder %s801_s25, 0 }
   0x8   : > { %p163_p2 = scmp.lt.s32.totalorder %s741_s21, 3  ;;  %s743_s27 = smov [#allocation5]  }
   0x9   : > { %s176_s28 = sshll.u32 %s743_s27, 4  ;;  %s191_s6 = sshll.u32 %s937_s3, 4  ;;  %s177_s28 = int_to_ptr.vmem [resolvable:$true] %s176_s28  ;;  %s192_s6 = int_to_ptr.hbm [resolvable:$true] %s191_s6 }
   0xa   : > { %p806_p3 = pnand %p490_p0, %p163_p2  ;;  %s744_s7 = smov [#allocation7]  }
   0xb   : > { %s193_s8 = sshll.u32 %s744_s7, 4  ;;  %s745_s9 = smov 128   ;;  %s194_s8 = int_to_ptr.vmem [resolvable:$true] %s193_s8 }
   0xc   : > { %p520_p4 = pneg %p806_p3  ;;  %s746_s10 = smov 8  }
   0xd   : > { %s489_s11 = sadd.s32 4294967294, %s741_s21   ;;  %s820_s12 = sadd.s32 1, %s741_s21  }
   0xe   : > { %p521_p6 = pnand %p520_p4, %p43_p1  ;;  %s26_s13 = ssub.s32 %s741_s21, %s820_s12 }
   0xf   : > { %s29_s14 = sadd.s32 1, %s737_s20  ;;  %p27_p7 = scmp.eq.s32.totalorder %s26_s13, 0 }
  0x10   : > { %523 = dma.hbm_to_vmem [thread:$0]  (!%p521_p6), %s175_s24, 512, %s177_s28, [#allocation6], %s745_s9, %s745_s9, %s746_s10  }
  0x11   : > { %526 = dma.hbm_to_vmem [thread:$0]  (!%p521_p6), %s192_s6, 512, %s194_s8, [#allocation6], %s745_s9, %s745_s9, %s746_s10  }
  0x12   : > { %p36_p8 = scmp.ne.s32.totalorder %s737_s20, %s733_s19  ;;  %p37_p9 = scmp.eq.s32.totalorder %s741_s21, 0 }
  0x13   : > { %p42_p10 = scmp.ne.s32.totalorder %s733_s19, %s729_s18  ;;  %p150_p13 = scmp.eq.s32.totalorder %s801_s25, 1 }
  0x14   : > { %s831_s15 = scalar_select %p27_p7, %s737_s20, %s29_s14  }
  0x15   : > { %p833_p11 = por %p37_p9, %p36_p8  ;;  %p839_p12 = por %p43_p1, %p42_p10 }
  0x16   : > { %p156_p0 = scmp.eq.s32.totalorder %s489_s11, 1  ;;  %p537_p2 = scmp.lt.s32.totalorder %s741_s21, 2 }
  0x17   : > { %s210_s22 = sand.u32 1, %s737_s20   ;;  %p846_p4 = por %p150_p13, %p36_p8 }
  0x18   : > { %p850_p6 = por %p156_p0, %p42_p10  ;;  %s494_s27 = sshll.u32 %s210_s22, 3 }
  0x19   : > { %s495_s28 = sshll.u32 %s741_s21, 3  ;;  %s214_s7 = scalar_lea.vmem [#allocation2], %s494_s27 }
  0x1a   : > { %s218_s6 = scalar_lea.hbm %s934_s0, %s495_s28  ;;  %s222_s8 = sshll.u32 %s214_s7, 4  ;;  %s223_s8 = int_to_ptr.vmem [resolvable:$true] %s222_s8 }
  0x1b   : > { %s220_s9 = sshll.u32 %s218_s6, 4  ;;  %p860_p7 = pnand %p537_p2, %p833_p11  ;;  %s221_s9 = int_to_ptr.hbm [resolvable:$true] %s220_s9 }
  0x1c   : > { %s211_s11 = scalar_lea.sflag [#allocation3], %s210_s22  ;;  %s641_s13 = sshra.s32 %s221_s9, 4  ;;  %s642_s13 = int_to_ptr.hbm [resolvable:$true] %s641_s13 }
  0x1d   : > { %s643_s14 = scalar_lea.hbm %s642_s13, 8  ;;  %p645_p9 = pneg %p860_p7 }
  0x1e   : > { %p644_p8 = scmp.ne.s32.totalorder %s642_s13, %s643_s14  ;;  %s648_s29 = scalar_lea.hbm %s934_s0, 16 }
  0x1f   : > { %p649_p11 = scmp.lt.s32.totalorder %s642_s13, %s934_s0  ;;  %p650_p0 = scmp.lt.s32.totalorder %s648_s29, %s643_s14 }
  0x20   : > { %p646_p10 = pnand %p645_p9, %p644_p8 }
  0x21   : > { %p651_p2 = por %p650_p0, %p649_p11 }
  0x22   : > { %p647_p13 = pneg %p646_p10 }
  0x24   : > { %p652_p5 = pnand %p651_p2, %p647_p13 }
  0x26   : > { %655 = shalt.err (!%p652_p5)
}
  0x27   : > { %530 = dma.hbm_to_vmem [thread:$0]  (!%p860_p7), %s221_s9, 128, %s223_s8, %s211_s11  }
  0x28   : > { %231 = sbr.rel (%p806_p3) target bundleno = 366 (0x16e), region = 40  ;;  %s877_s22 = sand.u32 (!%p806_p3), 1, %s733_s19  }
  0x29   : > { %s497_s6 = sshll.u32 (!%p806_p3), %s877_s22, 3  ;;  %s234_s7 = scalar_lea.sflag (!%p806_p3), [#allocation3], %s877_s22 }
  0x2a   : > { %s237_s13 = scalar_lea.vmem (!%p806_p3), [#allocation2], %s497_s6 }
  0x2d   : > { %716 = dma.done.wait (%p839_p12), %s234_s7, 128  }
  0x2e   : > { %718 = vsyncadd (%p839_p12), %s234_s7, 4294967168 }
  0x2f   : > { %720 = dma.done.wait (%p43_p1), [#allocation6], 1024  }
  0x30   : > { %722 = vsyncadd (%p43_p1), [#allocation6], 4294966272  ;;  %v279_v0 = vld [vmem:[#allocation5 + $0x18] sm:$0xff]  ;;  %v278_v1 = vld [vmem:[#allocation5 + $0x10] sm:$0xff]  ;;  %vm284_vm0 = vcmask 261120   ;;  %s505_s8 = sshll.u32 %s801_s25, 3 }
  0x31   : > { %300 = vmatpush.msra.mxu0 %v279_v0  ;;  %v277_v2 = vld [vmem:[#allocation5 + $0x8] sm:$0xff]  ;;  %v276_v3 = vld [vmem:[#allocation5] sm:$0xff]  ;;  %v275_v4 = vld [vmem:[%s237_s13] sm:$0xff]  ;;  %s395_s11 = scalar_lea.hbm %s939_s5, %s505_s8  ;;  %s274_s28 = scalar_lea.vmem [#allocation8], %s497_s6 }
  0x32   : > { %v577_v5 = vld [vmem:[%s936_s2] ss:$0 sm:$0xff]  ;;  %v355_v17 = vld [vmem:[#allocation7 + $0x18] sm:$0xff]  ;;  %v353_v21 = vld [vmem:[#allocation7 + $0x8] sm:$0xff]  ;;  %s397_s29 = sshll.u32 %s274_s28, 4  ;;  %s399_s30 = sshll.u32 %s395_s11, 4  ;;  %s398_s29 = int_to_ptr.vmem [resolvable:$true] %s397_s29  ;;  %s400_s30 = int_to_ptr.hbm [resolvable:$true] %s399_s30 }
  0x33   : > { %301 = vmatpush.msra.mxu0 %v278_v1  ;;  %v354_v18 = vld [vmem:[#allocation7 + $0x10] sm:$0xff]  ;;  %375 = vmatpush.msra.mxu1 %v355_v17  ;;  %v352_v23 = vld [vmem:[#allocation7] sm:$0xff]  ;;  %s385_s16 = scalar_lea.sflag [#allocation4], %s877_s22  ;;  %s685_s25 = sshra.s32 %s400_s30, 4  ;;  %s686_s25 = int_to_ptr.hbm [resolvable:$true] %s685_s25 }
  0x34   : > { %v578_v51 = vld [vmem:[%s938_s4] ss:$0 sm:$0xff]  ;;  %s687_s7 = scalar_lea.hbm %s686_s25, 8  ;;  %s691_s17 = scalar_lea.hbm %s939_s5, 16 }
  0x35   : > { %302 = vmatpush.msra.mxu0 %v277_v2  ;;  %376 = vmatpush.msra.mxu1 %v354_v18  ;;  %p688_p1 = scmp.ne.s32.totalorder %s686_s25, %s687_s7  ;;  %p692_p12 = scmp.lt.s32.totalorder %s686_s25, %s939_s5 }
  0x36   : > { %p693_p7 = scmp.lt.s32.totalorder %s691_s17, %s687_s7 }
  0x37   : > { %303 = vmatpush.msra.mxu0 %v276_v3  ;;  %377 = vmatpush.msra.mxu1 %v353_v21  ;;  %p689_p3 = pnand %p688_p1, %p846_p4 }
  0x38   : > { %501 = vmatmul.msk.f32.vlgmr.msra.gmra.mxu0 %vm284_vm0, %v275_v4  ;;  %p694_p8 = por %p693_p7, %p692_p12 }
  0x39   : > { %378 = vmatpush.msra.mxu1 %v352_v23  ;;  %p690_p5 = pneg %p689_p3 }
  0x3b   : > { %p695_p9 = pnand %p694_p8, %p690_p5 }
  0xb5   : > { %v305_v6 = vpop.f32.mrf.mxu0 }
  0xb6   : > { %v306_v7 = vadd.f32 %v577_v5, %v305_v6 }
  0xb8   : > { %v309_v8 = vmul.f32 0.70710677, %v306_v7  ;;  %v308_v48 = vmul.f32 0.5, %v306_v7 }
  0xba   : > { %v310_v9 = vmul.f32 %v309_v8, %v309_v8 }
  0xbc   : > { %v311_v10 = vmin.f32 %v310_v9, 16.0 }
  0xbe   : > { %v312_v11 = vmul.f32 2.1237322e-06, %v311_v10  ;;  %v323_v12 = vmul.f32 3.8918573e-05, %v311_v10 }
  0xc0   : > { %v313_v13 = vadd.f32 0.00028619796, %v312_v11  ;;  %v324_v14 = vadd.f32 0.001143296, %v323_v12 }
  0xc2   : > { %v314_v15 = vmul.f32 %v313_v13, %v311_v10  ;;  %v325_v16 = vmul.f32 %v324_v14, %v311_v10 }
  0xc4   : > { %v326_v19 = vadd.f32 0.014752088, %v325_v16  ;;  %v315_v20 = vadd.f32 0.0036580483, %v314_v15 }
  0xc6   : > { %v327_v22 = vmul.f32 %v326_v19, %v311_v10  ;;  %v316_v25 = vmul.f32 %v315_v20, %v311_v10 }
  0xc8   : > { %v328_v24 = vadd.f32 0.112945676, %v327_v22  ;;  %v317_v28 = vadd.f32 0.05243302, %v316_v25 }
  0xca   : > { %v329_v26 = vmul.f32 %v328_v24, %v311_v10  ;;  %v318_v31 = vmul.f32 %v317_v28, %v311_v10 }
  0xcc   : > { %v330_v27 = vadd.f32 0.4994258, %v329_v26  ;;  %v319_v32 = vadd.f32 0.18741608, %v318_v31 }
  0xce   : > { %v331_v29 = vmul.f32 %v330_v27, %v311_v10  ;;  %v320_v34 = vmul.f32 %v319_v32, %v311_v10 }
  0xd0   : > { %v332_v30 = vadd.f32 1.0, %v331_v29  ;;  %v321_v38 = vadd.f32 1.1283791, %v320_v34 }
  0xd2   : > { %579 = vrcp.f32 %v332_v30  ;;  %v344_v37 = vand.u32 2147483648, %v332_v30  ;;  %v342_v40 = vand.u32 2147483647, %v332_v30  ;;  %vm338_vm2 = vweird.f32 %v332_v30 }
  0xd3   : > { %v322_v43 = vmul.f32 %v321_v38, %v309_v8 }
  0xd4   : > { %v345_v42 = vor.u32 1.1754944e-38, %v344_v37  ;;  %vm343_vm4 = vcmp.eq.f32.partialorder %v342_v40, 8.507059e+37 }
  0xd8   : > { %v580_v33 = vpop.eup %579 }
  0xd9   : > { %v334_v35 = vmul.f32 %v580_v33, %v332_v30  ;;  %vm339_vm1 = vweird.f32 %v580_v33 }
  0xda   : > { %vm340_vm3 = vmor %vm338_vm2, %vm339_vm1 }
  0xdb   : > { %v335_v36 = vsub.f32 1.0, %v334_v35 }
  0xdd   : > { %v336_v39 = vmul.f32 %v580_v33, %v335_v36 }
  0xdf   : > { %v337_v41 = vadd.f32 %v580_v33, %v336_v39 }
  0xe1   : > { %v341_v44 = vsel %vm340_vm3, %v580_v33, %v337_v41 }
  0xe2   : > { %v346_v45 = vsel %vm343_vm4, %v345_v42, %v341_v44 }
  0xe3   : > { %v347_v46 = vmul.f32 %v346_v45, %v322_v43 }
  0xe5   : > { %v502_v47 = vclamps-f32 %v347_v46, 1.0 }
  0xe7   : > { %v350_v49 = vadd.f32 1.0, %v502_v47 }
  0xe9   : > { %v351_v50 = vmul.f32 %v350_v49, %v308_v48 }
  0xeb   : > { %503 = vmatmul.msk.f32.vlgmr.msra.gmra.mxu1 %vm284_vm0, %v351_v50 }
 0x168   : > { %v380_v52 = vpop.f32.mrf.mxu1 }
 0x169   : > { %v381_v53 = vadd.f32 %v578_v51, %v380_v52 }
 0x16b   : > { %383 = vst [vmem:[%s274_s28] sm:$0xff] %v381_v53 }
 0x16c   : > { %698 = shalt.err (!%p695_p9)
}
 0x16d   : > { %518 = dma.vmem_to_hbm [thread:$0]  (%p846_p4), %s398_s29, 128, %s400_s30, %s385_s16  }
 0x16e PF: > { %s411_s22 = sand.u32 1, %s729_s18   ;;  %p946_p10 = scmp.ge.s32.totalorder %s741_s21, 2 }
 0x16f   : > { %s412_s9 = scalar_lea.sflag [#allocation4], %s411_s22 }
 0x170   : > { %p532_p13 = pnand %p946_p10, %p850_p6 }
 0x172   : > { %p533_p11 = pneg %p532_p13 }
 0x174   : > { %724 = dma.done.wait (%p533_p11), %s412_s9, 128  }
 0x175   : > { %726 = vsyncadd (%p533_p11), %s412_s9, 4294967168  ;;  %p19_p0 = scmp.ge.s32.totalorder %s820_s12, 4   ;;  %s947_s18 = smov %s733_s19 }
 0x176   : > { %s948_s19 = smov %s737_s20  ;;  %s949_s20 = smov %s831_s15 }
 0x177   : > { %s950_s21 = smov %s820_s12  ;;  %21 = sbr.rel (!%p19_p0) target bundleno = 6 (0x6), region = 93 }
 0x17c   :  { %418 = vsyncpa [#allocation3], 1 }
 0x17d   :  { %420 = vsyncpa [#allocation3 + $0x1], 1 }
 0x17e   :  { %421 = vsyncpa [#allocation6], 1 }
 0x17f   :  { %422 = vsyncpa [#allocation4], 1 }
 0x180   :  { %424 = vsyncpa [#allocation4 + $0x1], 1 }

// kernel: tpu_custom_call.1
= control target key start
LH: loop header
LB: loop body
LE: loop exit
PB: predicated region body
PF: predicated region fallthrough
CT: control target
= control target key end

     0   :  { %10 = vsyncpa [#allocation3], 0  ;;  %s934_s0 = inlined_call_operand.hbm [shape: f32[16,32], index: 0, kind: input, shape index: {}]   ;;  %s935_s1 = inlined_call_operand.hbm [shape: f32[32,32], index: 1, kind: input, shape index: {}]   ;;  %s936_s2 = inlined_call_operand.vmem [shape: f32[1,32], index: 2, kind: input, shape index: {}]   ;;  %s937_s3 = inlined_call_operand.hbm [shape: f32[32,128], index: 3, kind: input, shape index: {}]   ;;  %s938_s4 = inlined_call_operand.vmem [shape: f32[1,128], index: 4, kind: input, shape index: {}]   ;;  %s939_s5 = inlined_call_operand.hbm [shape: f32[16,128], index: 5, kind: output, shape index: {}]  }
   0x1   :  { %12 = vsyncpa [#allocation3 + $0x1], 0 }
   0x2   :  { %13 = vsyncpa [#allocation6], 0 }
   0x3   :  { %14 = vsyncpa [#allocation4], 0 }
   0x4   :  { %16 = vsyncpa [#allocation4 + $0x1], 0  ;;  %s777_s18 = smov 0   ;;  %s779_s19 = smov 0  }
   0x5   :  { %s781_s20 = smov 0   ;;  %s783_s21 = smov 0  }
   0x6 LB: > { %s174_s24 = sshll.u32 %s935_s1, 4  ;;  %s801_s25 = sadd.s32 4294967295, %s741_s21   ;;  %s741_s21 = sphi %s783_s21, %s950_s21   ;;  %s737_s20 = sphi %s781_s20, %s949_s20   ;;  %s733_s19 = sphi %s779_s19, %s948_s19   ;;  %s729_s18 = sphi %s777_s18, %s947_s18   ;;  %s175_s24 = int_to_ptr.hbm [resolvable:$true] %s174_s24 }
   0x7   : > { %p490_p0 = scmp.ge.s32.totalorder %s741_s21, 1  ;;  %p43_p1 = scmp.eq.s32.totalorder %s801_s25, 0 }
   0x8   : > { %p163_p2 = scmp.lt.s32.totalorder %s741_s21, 3  ;;  %s743_s27 = smov [#allocation5]  }
   0x9   : > { %s176_s28 = sshll.u32 %s743_s27, 4  ;;  %s191_s6 = sshll.u32 %s937_s3, 4  ;;  %s177_s28 = int_to_ptr.vmem [resolvable:$true] %s176_s28  ;;  %s192_s6 = int_to_ptr.hbm [resolvable:$true] %s191_s6 }
   0xa   : > { %p806_p3 = pnand %p490_p0, %p163_p2  ;;  %s744_s7 = smov [#allocation7]  }
   0xb   : > { %s193_s8 = sshll.u32 %s744_s7, 4  ;;  %s745_s9 = smov 128   ;;  %s194_s8 = int_to_ptr.vmem [resolvable:$true] %s193_s8 }
   0xc   : > { %p520_p4 = pneg %p806_p3  ;;  %s746_s10 = smov 8  }
   0xd   : > { %s489_s11 = sadd.s32 4294967294, %s741_s21   ;;  %s820_s12 = sadd.s32 1, %s741_s21  }
   0xe   : > { %p521_p6 = pnand %p520_p4, %p43_p1  ;;  %s26_s13 = ssub.s32 %s741_s21, %s820_s12 }
   0xf   : > { %s29_s14 = sadd.s32 1, %s737_s20  ;;  %p27_p7 = scmp.eq.s32.totalorder %s26_s13, 0 }
  0x10   : > { %523 = dma.hbm_to_vmem [thread:$0]  (!%p521_p6), %s175_s24, 512, %s177_s28, [#allocation6], %s745_s9, %s745_s9, %s746_s10  }
  0x11   : > { %526 = dma.hbm_to_vmem [thread:$0]  (!%p521_p6), %s192_s6, 512, %s194_s8, [#allocation6], %s745_s9, %s745_s9, %s746_s10  }
  0x12   : > { %p36_p8 = scmp.ne.s32.totalorder %s737_s20, %s733_s19  ;;  %p37_p9 = scmp.eq.s32.totalorder %s741_s21, 0 }
  0x13   : > { %p42_p10 = scmp.ne.s32.totalorder %s733_s19, %s729_s18  ;;  %p150_p13 = scmp.eq.s32.totalorder %s801_s25, 1 }
  0x14   : > { %s831_s15 = scalar_select %p27_p7, %s737_s20, %s29_s14  }
  0x15   : > { %p833_p11 = por %p37_p9, %p36_p8  ;;  %p839_p12 = por %p43_p1, %p42_p10 }
  0x16   : > { %p156_p0 = scmp.eq.s32.totalorder %s489_s11, 1  ;;  %p537_p2 = scmp.lt.s32.totalorder %s741_s21, 2 }
  0x17   : > { %s210_s22 = sand.u32 1, %s737_s20   ;;  %p846_p4 = por %p150_p13, %p36_p8 }
  0x18   : > { %p850_p6 = por %p156_p0, %p42_p10  ;;  %s494_s27 = sshll.u32 %s210_s22, 3 }
  0x19   : > { %s495_s28 = sshll.u32 %s741_s21, 3  ;;  %s214_s7 = scalar_lea.vmem [#allocation2], %s494_s27 }
  0x1a   : > { %s218_s6 = scalar_lea.hbm %s934_s0, %s495_s28  ;;  %s222_s8 = sshll.u32 %s214_s7, 4  ;;  %s223_s8 = int_to_ptr.vmem [resolvable:$true] %s222_s8 }
  0x1b   : > { %s220_s9 = sshll.u32 %s218_s6, 4  ;;  %p860_p7 = pnand %p537_p2, %p833_p11  ;;  %s221_s9 = int_to_ptr.hbm [resolvable:$true] %s220_s9 }
  0x1c   : > { %s211_s11 = scalar_lea.sflag [#allocation3], %s210_s22  ;;  %s641_s13 = sshra.s32 %s221_s9, 4  ;;  %s642_s13 = int_to_ptr.hbm [resolvable:$true] %s641_s13 }
  0x1d   : > { %s643_s14 = scalar_lea.hbm %s642_s13, 8  ;;  %p645_p9 = pneg %p860_p7 }
  0x1e   : > { %p644_p8 = scmp.ne.s32.totalorder %s642_s13, %s643_s14  ;;  %s648_s29 = scalar_lea.hbm %s934_s0, 16 }
  0x1f   : > { %p649_p11 = scmp.lt.s32.totalorder %s642_s13, %s934_s0  ;;  %p650_p0 = scmp.lt.s32.totalorder %s648_s29, %s643_s14 }
  0x20   : > { %p646_p10 = pnand %p645_p9, %p644_p8 }
  0x21   : > { %p651_p2 = por %p650_p0, %p649_p11 }
  0x22   : > { %p647_p13 = pneg %p646_p10 }
  0x24   : > { %p652_p5 = pnand %p651_p2, %p647_p13 }
  0x26   : > { %655 = shalt.err (!%p652_p5)
}
  0x27   : > { %530 = dma.hbm_to_vmem [thread:$0]  (!%p860_p7), %s221_s9, 128, %s223_s8, %s211_s11  }
  0x28   : > { %231 = sbr.rel (%p806_p3) target bundleno = 366 (0x16e), region = 40  ;;  %s877_s22 = sand.u32 (!%p806_p3), 1, %s733_s19  }
  0x29   : > { %s497_s6 = sshll.u32 (!%p806_p3), %s877_s22, 3  ;;  %s234_s7 = scalar_lea.sflag (!%p806_p3), [#allocation3], %s877_s22 }
  0x2a   : > { %s237_s13 = scalar_lea.vmem (!%p806_p3), [#allocation2], %s497_s6 }
  0x2d   : > { %716 = dma.done.wait (%p839_p12), %s234_s7, 128  }
  0x2e   : > { %718 = vsyncadd (%p839_p12), %s234_s7, 4294967168 }
  0x2f   : > { %720 = dma.done.wait (%p43_p1), [#allocation6], 1024  }
  0x30   : > { %722 = vsyncadd (%p43_p1), [#allocation6], 4294966272  ;;  %v279_v0 = vld [vmem:[#allocation5 + $0x18] sm:$0xff]  ;;  %v278_v1 = vld [vmem:[#allocation5 + $0x10] sm:$0xff]  ;;  %vm284_vm0 = vcmask 261120   ;;  %s505_s8 = sshll.u32 %s801_s25, 3 }
  0x31   : > { %300 = vmatpush.msra.mxu0 %v279_v0  ;;  %v277_v2 = vld [vmem:[#allocation5 + $0x8] sm:$0xff]  ;;  %v276_v3 = vld [vmem:[#allocation5] sm:$0xff]  ;;  %v275_v4 = vld [vmem:[%s237_s13] sm:$0xff]  ;;  %s395_s11 = scalar_lea.hbm %s939_s5, %s505_s8  ;;  %s274_s28 = scalar_lea.vmem [#allocation8], %s497_s6 }
  0x32   : > { %v577_v5 = vld [vmem:[%s936_s2] ss:$0 sm:$0xff]  ;;  %v355_v17 = vld [vmem:[#allocation7 + $0x18] sm:$0xff]  ;;  %v353_v21 = vld [vmem:[#allocation7 + $0x8] sm:$0xff]  ;;  %s397_s29 = sshll.u32 %s274_s28, 4  ;;  %s399_s30 = sshll.u32 %s395_s11, 4  ;;  %s398_s29 = int_to_ptr.vmem [resolvable:$true] %s397_s29  ;;  %s400_s30 = int_to_ptr.hbm [resolvable:$true] %s399_s30 }
  0x33   : > { %301 = vmatpush.msra.mxu0 %v278_v1  ;;  %v354_v18 = vld [vmem:[#allocation7 + $0x10] sm:$0xff]  ;;  %375 = vmatpush.msra.mxu1 %v355_v17  ;;  %v352_v23 = vld [vmem:[#allocation7] sm:$0xff]  ;;  %s385_s16 = scalar_lea.sflag [#allocation4], %s877_s22  ;;  %s685_s25 = sshra.s32 %s400_s30, 4  ;;  %s686_s25 = int_to_ptr.hbm [resolvable:$true] %s685_s25 }
  0x34   : > { %v578_v51 = vld [vmem:[%s938_s4] ss:$0 sm:$0xff]  ;;  %s687_s7 = scalar_lea.hbm %s686_s25, 8  ;;  %s691_s17 = scalar_lea.hbm %s939_s5, 16 }
  0x35   : > { %302 = vmatpush.msra.mxu0 %v277_v2  ;;  %376 = vmatpush.msra.mxu1 %v354_v18  ;;  %p688_p1 = scmp.ne.s32.totalorder %s686_s25, %s687_s7  ;;  %p692_p12 = scmp.lt.s32.totalorder %s686_s25, %s939_s5 }
  0x36   : > { %p693_p7 = scmp.lt.s32.totalorder %s691_s17, %s687_s7 }
  0x37   : > { %303 = vmatpush.msra.mxu0 %v276_v3  ;;  %377 = vmatpush.msra.mxu1 %v353_v21  ;;  %p689_p3 = pnand %p688_p1, %p846_p4 }
  0x38   : > { %501 = vmatmul.msk.f32.vlgmr.msra.gmra.mxu0 %vm284_vm0, %v275_v4  ;;  %p694_p8 = por %p693_p7, %p692_p12 }
  0x39   : > { %378 = vmatpush.msra.mxu1 %v352_v23  ;;  %p690_p5 = pneg %p689_p3 }
  0x3b   : > { %p695_p9 = pnand %p694_p8, %p690_p5 }
  0xb5   : > { %v305_v6 = vpop.f32.mrf.mxu0 }
  0xb6   : > { %v306_v7 = vadd.f32 %v577_v5, %v305_v6 }
  0xb8   : > { %v309_v8 = vmul.f32 0.70710677, %v306_v7  ;;  %v308_v48 = vmul.f32 0.5, %v306_v7 }
  0xba   : > { %v310_v9 = vmul.f32 %v309_v8, %v309_v8 }
  0xbc   : > { %v311_v10 = vmin.f32 %v310_v9, 16.0 }
  0xbe   : > { %v312_v11 = vmul.f32 2.1237322e-06, %v311_v10  ;;  %v323_v12 = vmul.f32 3.8918573e-05, %v311_v10 }
  0xc0   : > { %v313_v13 = vadd.f32 0.00028619796, %v312_v11  ;;  %v324_v14 = vadd.f32 0.001143296, %v323_v12 }
  0xc2   : > { %v314_v15 = vmul.f32 %v313_v13, %v311_v10  ;;  %v325_v16 = vmul.f32 %v324_v14, %v311_v10 }
  0xc4   : > { %v326_v19 = vadd.f32 0.014752088, %v325_v16  ;;  %v315_v20 = vadd.f32 0.0036580483, %v314_v15 }
  0xc6   : > { %v327_v22 = vmul.f32 %v326_v19, %v311_v10  ;;  %v316_v25 = vmul.f32 %v315_v20, %v311_v10 }
  0xc8   : > { %v328_v24 = vadd.f32 0.112945676, %v327_v22  ;;  %v317_v28 = vadd.f32 0.05243302, %v316_v25 }
  0xca   : > { %v329_v26 = vmul.f32 %v328_v24, %v311_v10  ;;  %v318_v31 = vmul.f32 %v317_v28, %v311_v10 }
  0xcc   : > { %v330_v27 = vadd.f32 0.4994258, %v329_v26  ;;  %v319_v32 = vadd.f32 0.18741608, %v318_v31 }
  0xce   : > { %v331_v29 = vmul.f32 %v330_v27, %v311_v10  ;;  %v320_v34 = vmul.f32 %v319_v32, %v311_v10 }
  0xd0   : > { %v332_v30 = vadd.f32 1.0, %v331_v29  ;;  %v321_v38 = vadd.f32 1.1283791, %v320_v34 }
  0xd2   : > { %579 = vrcp.f32 %v332_v30  ;;  %v344_v37 = vand.u32 2147483648, %v332_v30  ;;  %v342_v40 = vand.u32 2147483647, %v332_v30  ;;  %vm338_vm2 = vweird.f32 %v332_v30 }
  0xd3   : > { %v322_v43 = vmul.f32 %v321_v38, %v309_v8 }
  0xd4   : > { %v345_v42 = vor.u32 1.1754944e-38, %v344_v37  ;;  %vm343_vm4 = vcmp.eq.f32.partialorder %v342_v40, 8.507059e+37 }
  0xd8   : > { %v580_v33 = vpop.eup %579 }
  0xd9   : > { %v334_v35 = vmul.f32 %v580_v33, %v332_v30  ;;  %vm339_vm1 = vweird.f32 %v580_v33 }
  0xda   : > { %vm340_vm3 = vmor %vm338_vm2, %vm339_vm1 }
  0xdb   : > { %v335_v36 = vsub.f32 1.0, %v334_v35 }
  0xdd   : > { %v336_v39 = vmul.f32 %v580_v33, %v335_v36 }
  0xdf   : > { %v337_v41 = vadd.f32 %v580_v33, %v336_v39 }
  0xe1   : > { %v341_v44 = vsel %vm340_vm3, %v580_v33, %v337_v41 }
  0xe2   : > { %v346_v45 = vsel %vm343_vm4, %v345_v42, %v341_v44 }
  0xe3   : > { %v347_v46 = vmul.f32 %v346_v45, %v322_v43 }
  0xe5   : > { %v502_v47 = vclamps-f32 %v347_v46, 1.0 }
  0xe7   : > { %v350_v49 = vadd.f32 1.0, %v502_v47 }
  0xe9   : > { %v351_v50 = vmul.f32 %v350_v49, %v308_v48 }
  0xeb   : > { %503 = vmatmul.msk.f32.vlgmr.msra.gmra.mxu1 %vm284_vm0, %v351_v50 }
 0x168   : > { %v380_v52 = vpop.f32.mrf.mxu1 }
 0x169   : > { %v381_v53 = vadd.f32 %v578_v51, %v380_v52 }
 0x16b   : > { %383 = vst [vmem:[%s274_s28] sm:$0xff] %v381_v53 }
 0x16c   : > { %698 = shalt.err (!%p695_p9)
}
 0x16d   : > { %518 = dma.vmem_to_hbm [thread:$0]  (%p846_p4), %s398_s29, 128, %s400_s30, %s385_s16  }
 0x16e PF: > { %s411_s22 = sand.u32 1, %s729_s18   ;;  %p946_p10 = scmp.ge.s32.totalorder %s741_s21, 2 }
 0x16f   : > { %s412_s9 = scalar_lea.sflag [#allocation4], %s411_s22 }
 0x170   : > { %p532_p13 = pnand %p946_p10, %p850_p6 }
 0x172   : > { %p533_p11 = pneg %p532_p13 }
 0x174   : > { %724 = dma.done.wait (%p533_p11), %s412_s9, 128  }
 0x175   : > { %726 = vsyncadd (%p533_p11), %s412_s9, 4294967168  ;;  %p19_p0 = scmp.ge.s32.totalorder %s820_s12, 4   ;;  %s947_s18 = smov %s733_s19 }
 0x176   : > { %s948_s19 = smov %s737_s20  ;;  %s949_s20 = smov %s831_s15 }
 0x177   : > { %s950_s21 = smov %s820_s12  ;;  %21 = sbr.rel (!%p19_p0) target bundleno = 6 (0x6), region = 93 }
 0x17c   :  { %418 = vsyncpa [#allocation3], 1 }
 0x17d   :  { %420 = vsyncpa [#allocation3 + $0x1], 1 }
 0x17e   :  { %421 = vsyncpa [#allocation6], 1 }
 0x17f   :  { %422 = vsyncpa [#allocation4], 1 }
 0x180   :  { %424 = vsyncpa [#allocation4 + $0x1], 1 }

</bundles_post_ra>
